<compile_context>
chip_gen: v7x
topology: tpu7x:2x2x1
jax: 0.10.0
libtpu: 0.0.40
codegen_flags: <defaults>
</compile_context>

<pallas_src>
import math

import jax
import jax.numpy as jnp
from jax.experimental import pallas as pl
from jax.experimental.pallas import tpu as pltpu


def _update_unit_kernel(t_ref, s_ref, o_ref):
    # Elementwise add on the current VMEM tile (VPU work; kernel is HBM-bound).
    o_ref[...] = t_ref[...] + s_ref[...]


# Sublane packing granularity per itemsize (f32/i32 -> 8, bf16 -> 16, i8/fp8 -> 32).
_SUBLANE_PACK = {4: 8, 2: 16, 1: 32}

# Lane-dense width candidates, widest first (lane-dense output slabs are the
# biggest single store-efficiency lever).
_WIDTH_CANDIDATES = (32768, 16384, 8192, 4096, 2048, 1024, 512, 256, 128)


def _vmem_cap_bytes() -> int:
    """Physical VMEM capacity of the current chip; conservative fallback (v7x)."""
    try:
        info = pltpu.get_tpu_info()
        cap = getattr(info, "vmem_capacity_bytes", None)
        if cap:
            return int(cap)
    except Exception:
        pass
    return 64 << 20


def _pick_tile_rows(n_rows: int, budget_rows: int, pack: int) -> int:
    """Largest multiple of `pack` <= budget_rows that divides n_rows exactly.

    Falls back to the largest pack-aligned size <= budget (ragged, masked
    final tile) if n_rows has no suitable divisor.
    """
    cap = (min(budget_rows, n_rows) // pack) * pack
    if cap < pack:
        return min(pack, n_rows)
    r = cap
    while r >= pack:
        if n_rows % r == 0:
            return r
        r -= pack
    return cap


def _tiled_add_2d(t2, s2, tile_rows: int, vmem_cap: int, alias_target: bool):
    """pallas_call over a 2-D (rows, width) view, tiled along rows."""
    n_rows, width = t2.shape
    itemsize = jnp.dtype(t2.dtype).itemsize
    total = n_rows * width
    grid = (pl.cdiv(n_rows, tile_rows),)
    tile_bytes = tile_rows * width * itemsize

    # 3 streams x 2 pipeline buffers + slack, capped below physical VMEM.
    vmem_limit = int(min(max(32 << 20, 6 * tile_bytes + (4 << 20)),
                         vmem_cap - (8 << 20)))

    spec = pl.BlockSpec((tile_rows, width), lambda i: (i, 0))
    return pl.pallas_call(
        _update_unit_kernel,
        out_shape=jax.ShapeDtypeStruct((n_rows, width), t2.dtype),
        grid=grid,
        in_specs=[spec, spec],
        out_specs=spec,
        input_output_aliases={0: 0} if alias_target else {},
        compiler_params=pltpu.CompilerParams(
            dimension_semantics=("parallel",),
            vmem_limit_bytes=vmem_limit,
        ),
        cost_estimate=pl.CostEstimate(
            flops=total,
            transcendentals=0,
            bytes_accessed=3 * total * itemsize,
        ),
    )(t2, s2)


def update_unit(target, source, *, block_bytes: int | None = None,
                alias_target: bool = False, min_pallas_bytes: int = 2 << 20):
    """out = target + source, as a tiled Pallas TPU kernel.

    alias_target=True only if `target` is actually donated at the jit boundary;
    otherwise XLA inserts a defensive full copy (extra HBM read+write).
    """
    assert target.shape == source.shape, "source dimension must be equal to target dimension"
    assert target.dtype == source.dtype, "source dtype must match target dtype"

    orig_shape = target.shape
    dtype = target.dtype
    itemsize = jnp.dtype(dtype).itemsize
    pack = _SUBLANE_PACK.get(itemsize, 8)
    total = int(math.prod(orig_shape))
    total_bytes = total * itemsize

    if total == 0 or total_bytes < min_pallas_bytes:
        # Tiny/empty inputs: custom-call launch + grid setup dominates; XLA's
        # fused elementwise add is already at roofline.
        return jnp.add(target, source)

    # ---- generation-aware block sizing ----
    vmem_cap = _vmem_cap_bytes()
    if block_bytes is None:
        block_bytes = (8 << 20) if vmem_cap <= (64 << 20) else (16 << 20)
    # Keep 6 * block (2 in + 1 out, double-buffered) + slack within VMEM.
    block_bytes = max(1 << 20, min(block_bytes, max(1 << 20, (vmem_cap - (12 << 20)) // 6)))

    # ---- choose a lane-dense 2-D view that needs NO padding (free reshape) ----
    width = None
    for cand in _WIDTH_CANDIDATES:
        if total % cand == 0 and (total // cand) >= pack:
            width = cand
            break
    if width is None:
        for cand in _WIDTH_CANDIDATES:
            if total % cand == 0:
                width = cand
                break

    if width is None:
        # No multiple-of-128 factorization of `total`: tile over leading dims
        # with the full trailing extent (full trailing dims are exempt from the
        # (8,128) divisibility rule), keeping VMEM bounded.
        lead, rest = 1, total
        for k in range(1, target.ndim):
            l = int(math.prod(orig_shape[:k]))
            r = total // l
            if l >= 2 and r * itemsize <= block_bytes:
                lead, rest = l, r
                break
        if lead < 2:
            # Nothing to tile over (or a single row already exceeds the budget):
            # XLA's fused add is at the HBM roofline and never over-allocates VMEM.
            return jnp.add(target, source)
        t2 = target.reshape(lead, rest)
        s2 = source.reshape(lead, rest)
        if lead <= pack:
            tile_rows = lead
        else:
            budget_rows = max(1, block_bytes // (rest * itemsize))
            if budget_rows >= lead and lead >= 2 * pack:
                budget_rows = -(-lead // 2)  # >= 2 steps so v7x's 2nd TC runs
            tile_rows = _pick_tile_rows(lead, budget_rows, pack)
        out2 = _tiled_add_2d(t2, s2, tile_rows, vmem_cap, alias_target)
        return out2.reshape(orig_shape)

    n_rows = total // width
    t2 = target.reshape(n_rows, width)   # free reshape: contiguous row-major view
    s2 = source.reshape(n_rows, width)

    # ---- tile sizing: ~block_bytes per input tile, sublane-pack aligned,
    #      preferring an exact divisor of n_rows (no masked ragged tail) ----
    budget_rows = max(pack, (block_bytes // (width * itemsize)) // pack * pack)
    if n_rows <= pack:
        tile_rows = n_rows          # single full-extent block
    elif budget_rows >= n_rows:
        # Whole slab fits one tile: split so both v7x TensorCores get work AND
        # each core still runs >= 2 steps (keeps the DMA pipeline overlapped).
        if n_rows >= 4 * pack:
            steps = 4
        elif n_rows >= 2 * pack:
            steps = 2
        else:
            steps = 1
        if steps == 1:
            tile_rows = n_rows
        else:
            cap = -(-n_rows // steps)          # ceil(n_rows / steps)
            cap = -(-cap // pack) * pack       # round up to pack
            tile_rows = _pick_tile_rows(n_rows, cap, pack)
    else:
        tile_rows = _pick_tile_rows(n_rows, budget_rows, pack)

    out2 = _tiled_add_2d(t2, s2, tile_rows, vmem_cap, alias_target)
    return out2.reshape(orig_shape)


if __name__ == "__main__":
    key = jax.random.PRNGKey(0)
    k1, k2, k3, k4 = jax.random.split(key, 4)

    # NCHW-shaped feature maps, consistent with how _Update_Unit is used.
    shape = (2, 4, 16, 16)
    target = jax.random.normal(k1, shape, dtype=jnp.float32)
    source = jax.random.normal(k2, shape, dtype=jnp.float32)
    ref = jax.block_until_ready(target + source)

    # 1) Force the Pallas path even at this tiny shape (eager).
    out = jax.block_until_ready(update_unit(target, source, min_pallas_bytes=0))
    assert out.shape == ref.shape
    assert jnp.allclose(out, ref, atol=1e-6, rtol=1e-6)

    # 2) Same kernel under jit (no aliasing declared -> no defensive copy).
    run = jax.jit(lambda t, s: update_unit(t, s, min_pallas_bytes=0))
    out_jit = jax.block_until_ready(run(target, source))
    assert jnp.allclose(out_jit, ref, atol=1e-6, rtol=1e-6)

    # 3) Default small-input path (falls back to fused XLA add).
    out_small = jax.block_until_ready(update_unit(target, source))
    assert jnp.allclose(out_small, ref, atol=1e-6, rtol=1e-6)

    # 4) A larger slab that exercises the multi-step grid, the divisor-based
    #    tile choice, and the 4-way split for v7x megacore.
    big_shape = (8, 32, 64, 64)
    tb = jax.random.normal(k3, big_shape, dtype=jnp.float32)
    sb = jax.random.normal(k4, big_shape, dtype=jnp.float32)
    refb = jax.block_until_ready(tb + sb)
    outb = jax.block_until_ready(jax.jit(update_unit)(tb, sb))
    assert outb.shape == refb.shape
    assert jnp.allclose(outb, refb, atol=1e-6, rtol=1e-6)

    print("KERNEL_OK")
</pallas_src>

<mosaic_0001>
module attributes {stable_mosaic.version = 11 : i64} {
  func.func @_update_unit_kernel(%arg0: i32, %arg1: memref<8x256xf32, #tpu.memory_space<vmem>>, %arg2: memref<8x256xf32, #tpu.memory_space<vmem>>, %arg3: memref<8x256xf32, #tpu.memory_space<vmem>>) attributes {dimension_semantics = [#tpu.dimension_semantics<parallel>], iteration_bounds = array<i64: 1>, scalar_prefetch = 0 : i64, scratch_operands = 0 : i64, tpu.core_type = #tpu.core_type<tc>, window_params = [{transform_indices = @transform_0, window_bounds = array<i64: 8, 256>}, {transform_indices = @transform_1, window_bounds = array<i64: 8, 256>}, {transform_indices = @transform_2, window_bounds = array<i64: 8, 256>}]} {
    %c0 = arith.constant 0 : index
    %c0_0 = arith.constant 0 : index
    %0 = vector.load %arg1[%c0, %c0_0] : memref<8x256xf32, #tpu.memory_space<vmem>>, vector<8x256xf32>
    %c0_1 = arith.constant 0 : index
    %c0_2 = arith.constant 0 : index
    %1 = vector.load %arg2[%c0_1, %c0_2] : memref<8x256xf32, #tpu.memory_space<vmem>>, vector<8x256xf32>
    %2 = arith.addf %0, %1 : vector<8x256xf32>
    %c0_3 = arith.constant 0 : index
    %c0_4 = arith.constant 0 : index
    %3 = vector.load %arg3[%c0_3, %c0_4] : memref<8x256xf32, #tpu.memory_space<vmem>>, vector<8x256xf32>
    tpu.vector_store %arg3[%c0_3, %c0_4], %2 {strides = array<i32>} : memref<8x256xf32, #tpu.memory_space<vmem>>, vector<8x256xf32>,
    return
  }
  func.func @transform_0(%arg0: i32) -> (i32, i32) {
    %c0_i32 = arith.constant 0 : i32
    %c0_i32_0 = arith.constant 0 : i32
    return %arg0, %c0_i32 : i32, i32
  }
  func.func @transform_1(%arg0: i32) -> (i32, i32) {
    %c0_i32 = arith.constant 0 : i32
    %c0_i32_0 = arith.constant 0 : i32
    return %arg0, %c0_i32 : i32, i32
  }
  func.func @transform_2(%arg0: i32) -> (i32, i32) {
    %c0_i32 = arith.constant 0 : i32
    %c0_i32_0 = arith.constant 0 : i32
    return %arg0, %c0_i32 : i32, i32
  }
}

</mosaic_0001>

<bundles_post_ra>
// kernel: tpu_custom_call.1
= control target key start
LH: loop header
LB: loop body
LE: loop exit
PB: predicated region body
PF: predicated region fallthrough
CT: control target
= control target key end

     0   :  { %7 = vsyncpa [#allocation3], 0  ;;  %s189_s0 = inlined_call_operand.hbm [shape: f32[8,256], index: 0, kind: input, shape index: {}]   ;;  %s190_s1 = inlined_call_operand.hbm [shape: f32[8,256], index: 1, kind: input, shape index: {}]   ;;  %s191_s2 = inlined_call_operand.hbm [shape: f32[8,256], index: 2, kind: output, shape index: {}]  }
   0x1   :  { %8 = vsyncpa [#allocation6], 0 }
   0x2   :  { %9 = vsyncpa [#allocation4], 0  ;;  %s135_s9 = smov [#allocation2]   ;;  %s136_s11 = smov [#allocation5]  }
   0x3   :  { %s16_s10 = sshll.u32 %s135_s9, 4  ;;  %s26_s12 = sshll.u32 %s136_s11, 4  ;;  %s17_s10 = int_to_ptr.vmem [resolvable:$true] %s16_s10  ;;  %s27_s12 = int_to_ptr.vmem [resolvable:$true] %s26_s12 }
   0x4   :  { %s63_s15 = scalar_lea.hbm %s189_s0, 256 }
   0x5   :  { %p64_p0 = scmp.ne.s32.totalorder %s189_s0, %s63_s15  ;;  %p67_p1 = scmp.lt.u32.totalorder %s63_s15, %s189_s0 }
   0x7   :  { %p69_p2 = pnand %p67_p1, %p64_p0 }
   0x9   :  { %72 = shalt.err (!%p69_p2)
}
   0xa   :  { %s73_s20 = scalar_lea.vmem %s17_s10, 256  ;;  %p78_p4 = scmp.lt.s32.totalorder %s17_s10, %s17_s10 }
   0xb   :  { %p74_p3 = scmp.ne.s32.totalorder %s17_s10, %s73_s20  ;;  %p79_p5 = scmp.lt.s32.totalorder %s73_s20, %s73_s20 }
   0xd   :  { %p80_p6 = por %p79_p5, %p78_p4 }
   0xf   :  { %p81_p7 = pnand %p80_p6, %p74_p3 }
  0x11   :  { %84 = shalt.err (!%p81_p7)
}
  0x12   :  { %19 = dma.hbm_to_vmem [thread:$0]  %s189_s0, 256, %s17_s10, [#allocation3]  }
  0x13   :  { %s85_s25 = scalar_lea.hbm %s190_s1, 256 }
  0x14   :  { %p86_p8 = scmp.ne.s32.totalorder %s190_s1, %s85_s25  ;;  %p89_p9 = scmp.lt.u32.totalorder %s85_s25, %s190_s1 }
  0x16   :  { %p91_p10 = pnand %p89_p9, %p86_p8 }
  0x18   :  { %94 = shalt.err (!%p91_p10)
}
  0x19   :  { %s95_s30 = scalar_lea.vmem %s27_s12, 256  ;;  %p100_p12 = scmp.lt.s32.totalorder %s27_s12, %s27_s12 }
  0x1a   :  { %p96_p11 = scmp.ne.s32.totalorder %s27_s12, %s95_s30  ;;  %p101_p13 = scmp.lt.s32.totalorder %s95_s30, %s95_s30 }
  0x1c   :  { %p102_p0 = por %p101_p13, %p100_p12 }
  0x1e   :  { %p103_p1 = pnand %p102_p0, %p96_p11 }
  0x20   :  { %106 = shalt.err (!%p103_p1)
}
  0x21   :  { %29 = dma.hbm_to_vmem [thread:$0]  %s190_s1, 256, %s27_s12, [#allocation6]  }
  0x22   :  { %129 = dma.done.wait [#allocation3], 256  }
  0x23   :  { %130 = vsyncadd [#allocation3], 4294967040 }
  0x24   :  { %131 = dma.done.wait [#allocation6], 256  }
  0x25   :  { %132 = vsyncadd [#allocation6], 4294967040  ;;  %s137_s4 = smov [#allocation7]   ;;  %v36_v0 = vld [vmem:[#allocation2] sm:$0xff]  ;;  %v38_v1 = vld [vmem:[#allocation5] sm:$0xff] }
  0x26   :  { %s50_s5 = sshll.u32 %s137_s4, 4  ;;  %v37_v2 = vld [vmem:[#allocation2 + $0x8] sm:$0xff]  ;;  %v40_v3 = vadd.f32 %v38_v1, %v36_v0  ;;  %v39_v4 = vld [vmem:[#allocation5 + $0x8] sm:$0xff]  ;;  %s51_s5 = int_to_ptr.vmem [resolvable:$true] %s50_s5 }
  0x27   :  { %v41_v5 = vadd.f32 %v39_v4, %v37_v2  ;;  %s107_s6 = scalar_lea.vmem %s51_s5, 256  ;;  %p112_p3 = scmp.lt.s32.totalorder %s51_s5, %s51_s5 }
  0x28   :  { %42 = vst [vmem:[#allocation7] sm:$0xff] %v40_v3  ;;  %p108_p2 = scmp.ne.s32.totalorder %s51_s5, %s107_s6  ;;  %p113_p4 = scmp.lt.s32.totalorder %s107_s6, %s107_s6 }
  0x29   :  { %43 = vst [vmem:[#allocation7 + $0x8] sm:$0xff] %v41_v5 }
  0x2a   :  { %p114_p5 = por %p113_p4, %p112_p3 }
  0x2c   :  { %p115_p6 = pnand %p114_p5, %p108_p2 }
  0x2e   :  { %118 = shalt.err (!%p115_p6)
}
  0x2f   :  { %s119_s8 = scalar_lea.hbm %s191_s2, 256 }
  0x30   :  { %p120_p7 = scmp.ne.s32.totalorder %s191_s2, %s119_s8  ;;  %p123_p8 = scmp.lt.u32.totalorder %s119_s8, %s191_s2 }
  0x32   :  { %p125_p9 = pnand %p123_p8, %p120_p7 }
  0x34   :  { %128 = shalt.err (!%p125_p9)
}
  0x35   :  { %53 = dma.vmem_to_hbm [thread:$0]  %s51_s5, 256, %s191_s2, [#allocation4]  }
  0x36   :  { %133 = dma.done.wait [#allocation4], 256  }
  0x37   :  { %134 = vsyncadd [#allocation4], 4294967040 }
  0x38   :  { %57 = vsyncpa [#allocation3], 1 }
  0x39   :  { %58 = vsyncpa [#allocation6], 1 }
  0x3a   :  { %59 = vsyncpa [#allocation4], 1 }

</bundles_post_ra>
